<compile_context>
chip_gen: v6e
topology: v6e:2x2x1
jax: 0.10.0
libtpu: 0.0.40
codegen_flags: <defaults>
</compile_context>

<pallas_src>
import jax
import jax.numpy as jnp
from jax.experimental import pallas as pl
from jax.experimental.pallas import tpu as pltpu


def _dot_attn_kernel(h_ref, e_ref, o_ref):
    # h_ref: (tB, H)   e_ref: (S, tB, 2H)   o_ref: (tB, S)
    h = h_ref[...].astype(jnp.float32)                    # (tB, H)
    e = e_ref[...].astype(jnp.float32)                    # (S, tB, 2H)

    # torch.cat([hidden, hidden], dim=1), done on the small block only.
    h2 = jnp.concatenate([h, h], axis=1)                  # (tB, 2H)

    # scores_sb[s, b] = <e[s, b, :], h2[b, :]>   (seq-first orientation,
    # reduction over the lane axis 2H; the big tensor is never transposed)
    scores_sb = jnp.sum(e * h2[None, :, :], axis=-1)      # (S, tB)  f32

    # Re-orient only the small score tile so the softmax axis (S) is the lane
    # axis and the (tB, S) store is lane-dense.
    scores = scores_sb.T                                  # (tB, S)

    # Numerically-stable softmax over the sequence axis (torch.softmax dim=1).
    m = jnp.max(scores, axis=-1, keepdims=True)
    p = jnp.exp(scores - m)
    denom = jnp.sum(p, axis=-1, keepdims=True)
    inv = pl.reciprocal(denom, approx=True)               # EUP slot, ~free
    o_ref[...] = (p * inv).astype(o_ref.dtype)


def _pick_batch_tile(B, S, two_h, itemsize, budget_bytes=8 * 1024 * 1024):
    """Largest batch tile that keeps blocks layout-legal (multiple of 8 or the
    full dim) and keeps one enc block under ~8 MiB (safe for v7x's 64 MiB
    VMEM with double buffering)."""
    if B <= 8 or B % 8 != 0:
        return B                      # full dim is always a legal block size
    tb = 8
    while (tb * 2 <= B and B % (tb * 2) == 0
           and S * (tb * 2) * two_h * itemsize <= budget_bytes):
        tb *= 2
    return tb


@jax.jit
def dot_product_attention(hidden, encoder_outputs):
    """hidden: (B, H); encoder_outputs: (S, B, 2H) (PyTorch seq-first layout).

    Returns attention weights (B, S), softmax over the sequence axis.
    """
    B, H = hidden.shape
    S, B2, two_h = encoder_outputs.shape
    assert B == B2 and two_h == 2 * H, "shape mismatch"

    tb = _pick_batch_tile(B, S, two_h, encoder_outputs.dtype.itemsize)
    grid = (B // tb,)

    return pl.pallas_call(
        _dot_attn_kernel,
        out_shape=jax.ShapeDtypeStruct((B, S), jnp.float32),
        grid=grid,
        in_specs=[
            pl.BlockSpec((tb, H), lambda i: (i, 0)),            # hidden
            pl.BlockSpec((S, tb, two_h), lambda i: (0, i, 0)),  # encoder_outputs
        ],
        out_specs=pl.BlockSpec((tb, S), lambda i: (i, 0)),
        compiler_params=pltpu.CompilerParams(
            dimension_semantics=("parallel",),   # batch tiles -> both TCs on v7x
            vmem_limit_bytes=64 * 1024 * 1024,   # raise above scoped default
        ),
    )(hidden, encoder_outputs)


def _reference(hidden, encoder_outputs):
    hidden2 = jnp.concatenate([hidden, hidden], axis=1)          # (B, 2H)
    enc = jnp.transpose(encoder_outputs, (1, 2, 0))              # (B, 2H, S)
    scores = jnp.einsum("bd,bds->bs", hidden2, enc)
    return jax.nn.softmax(scores, axis=1)


if __name__ == "__main__":
    key = jax.random.PRNGKey(0)
    k1, k2 = jax.random.split(key)

    # Small but TPU-layout-friendly shapes: B=8 (sublane), S=128 (lane-dense
    # output), hidden size H=64 (so 2H=128).
    B, H, S = 8, 64, 128
    hidden = jax.random.normal(k1, (B, H), dtype=jnp.float32)
    encoder_outputs = jax.random.normal(k2, (S, B, 2 * H), dtype=jnp.float32)

    out = dot_product_attention(hidden, encoder_outputs)
    out = jax.block_until_ready(out)

    ref = _reference(hidden, encoder_outputs)
    assert out.shape == (B, S)
    # approx reciprocal (EUP) => slightly looser tolerance than exact divide
    assert jnp.allclose(out, ref, atol=2e-3, rtol=2e-3), "mismatch vs reference"

    print("KERNEL_OK")
</pallas_src>

<mosaic_0001>
module attributes {stable_mosaic.version = 11 : i64} {
  func.func @_dot_attn_kernel(%arg0: i32, %arg1: memref<8x64xf32, #tpu.memory_space<vmem>>, %arg2: memref<128x8x128xf32, #tpu.memory_space<vmem>>, %arg3: memref<8x128xf32, #tpu.memory_space<vmem>>) attributes {dimension_semantics = [#tpu.dimension_semantics<parallel>], iteration_bounds = array<i64: 1>, scalar_prefetch = 0 : i64, scratch_operands = 0 : i64, tpu.core_type = #tpu.core_type<tc>, window_params = [{transform_indices = @transform_0, window_bounds = array<i64: 8, 64>}, {transform_indices = @transform_1, window_bounds = array<i64: 128, 8, 128>}, {transform_indices = @transform_2, window_bounds = array<i64: 8, 128>}]} {
    %c0 = arith.constant 0 : index
    %c0_0 = arith.constant 0 : index
    %0 = vector.load %arg1[%c0, %c0_0] : memref<8x64xf32, #tpu.memory_space<vmem>>, vector<8x64xf32>
    %c0_1 = arith.constant 0 : index
    %c0_2 = arith.constant 0 : index
    %c0_3 = arith.constant 0 : index
    %1 = vector.load %arg2[%c0_1, %c0_2, %c0_3] : memref<128x8x128xf32, #tpu.memory_space<vmem>>, vector<128x8x128xf32>
    %2 = tpu.concatenate %0, %0 in 1 : vector<8x64xf32>, vector<8x64xf32> -> vector<8x128xf32>
    %3 = vector.shape_cast %2 : vector<8x128xf32> to vector<1x8x128xf32>
    %4 = vector.broadcast %3 : vector<1x8x128xf32> to vector<128x8x128xf32>
    %5 = arith.mulf %1, %4 : vector<128x8x128xf32>
    %cst = arith.constant dense<0.000000e+00> : vector<128x8xf32>
    %6 = vector.multi_reduction <add>, %5, %cst [2] : vector<128x8x128xf32> to vector<128x8xf32>
    %7 = tpu.transpose %6, [1, 0] : vector<128x8xf32> -> vector<8x128xf32>
    %cst_4 = arith.constant dense<0xFF800000> : vector<8xf32>
    %8 = vector.multi_reduction <maximumf>, %7, %cst_4 [1] : vector<8x128xf32> to vector<8xf32>
    %9 = vector.shape_cast %8 : vector<8xf32> to vector<8x1xf32>
    %10 = vector.broadcast %9 : vector<8x1xf32> to vector<8x128xf32>
    %11 = arith.subf %7, %10 : vector<8x128xf32>
    %12 = math.exp %11 : vector<8x128xf32>
    %cst_5 = arith.constant dense<0.000000e+00> : vector<8xf32>
    %13 = vector.multi_reduction <add>, %12, %cst_5 [1] : vector<8x128xf32> to vector<8xf32>
    %14 = vector.shape_cast %13 : vector<8xf32> to vector<8x1xf32>
    %15 = tpu.reciprocal %14 {approx = true} : vector<8x1xf32> -> vector<8x1xf32>
    %16 = vector.broadcast %15 : vector<8x1xf32> to vector<8x128xf32>
    %17 = arith.mulf %12, %16 : vector<8x128xf32>
    %c0_6 = arith.constant 0 : index
    %c0_7 = arith.constant 0 : index
    %18 = vector.load %arg3[%c0_6, %c0_7] : memref<8x128xf32, #tpu.memory_space<vmem>>, vector<8x128xf32>
    tpu.vector_store %arg3[%c0_6, %c0_7], %17 {strides = array<i32>} : memref<8x128xf32, #tpu.memory_space<vmem>>, vector<8x128xf32>,
    return
  }
  func.func @transform_0(%arg0: i32) -> (i32, i32) {
    %c0_i32 = arith.constant 0 : i32
    %c0_i32_0 = arith.constant 0 : i32
    return %arg0, %c0_i32 : i32, i32
  }
  func.func @transform_1(%arg0: i32) -> (i32, i32, i32) {
    %c0_i32 = arith.constant 0 : i32
    %c0_i32_0 = arith.constant 0 : i32
    %c0_i32_1 = arith.constant 0 : i32
    return %c0_i32, %arg0, %c0_i32_0 : i32, i32, i32
  }
  func.func @transform_2(%arg0: i32) -> (i32, i32) {
    %c0_i32 = arith.constant 0 : i32
    %c0_i32_0 = arith.constant 0 : i32
    return %arg0, %c0_i32 : i32, i32
  }
}

</mosaic_0001>

<bundles_post_ra>
// kernel: dot_product_attention.1
= control target key start
LH: loop header
LB: loop body
LE: loop exit
PB: predicated region body
PF: predicated region fallthrough
CT: control target
= control target key end

     0   :  { %7 = vsyncpa [#allocation3], 0  ;;  %s2065_s0 = inlined_call_operand.hbm [shape: f32[8,64], index: 0, kind: input, shape index: {}]   ;;  %s2066_s1 = inlined_call_operand.hbm [shape: f32[128,8,128], index: 1, kind: input, shape index: {}]   ;;  %s2067_s2 = inlined_call_operand.hbm [shape: f32[8,128], index: 2, kind: output, shape index: {}]  }
   0x1   :  { %8 = vsyncpa [#allocation6], 0 }
   0x2   :  { %9 = vsyncpa [#allocation4], 0  ;;  %s1468_s9 = smov [#allocation2]   ;;  %s1469_s11 = smov [#allocation5]  }
   0x3   :  { %s16_s10 = sshll.u32 %s1468_s9, 4  ;;  %s25_s12 = sshll.u32 %s1469_s11, 4  ;;  %s17_s10 = int_to_ptr.vmem [resolvable:$true] %s16_s10  ;;  %s26_s12 = int_to_ptr.vmem [resolvable:$true] %s25_s12 }
   0x4   :  { %s1410_s13 = scalar_lea.vmem %s17_s10, 128  ;;  %p1415_p1 = scmp.lt.s32.totalorder %s17_s10, %s17_s10 }
   0x5   :  { %p1411_p0 = scmp.ne.s32.totalorder %s17_s10, %s1410_s13  ;;  %p1416_p2 = scmp.lt.s32.totalorder %s1410_s13, %s1410_s13 }
   0x7   :  { %p1417_p3 = por %p1416_p2, %p1415_p1 }
   0x9   :  { %p1418_p4 = pnand %p1417_p3, %p1411_p0 }
   0xb   :  { %1421 = shalt.err (!%p1418_p4)
}
   0xc   :  { %19 = dma.hbm_to_vmem [thread:$0]  %s2065_s0, 128, %s17_s10, [#allocation3]  }
   0xd   :  { %s1430_s16 = scalar_lea.vmem %s26_s12, 16384  ;;  %p1435_p6 = scmp.lt.s32.totalorder %s26_s12, %s26_s12 }
   0xe   :  { %p1431_p5 = scmp.ne.s32.totalorder %s26_s12, %s1430_s16  ;;  %p1436_p7 = scmp.lt.s32.totalorder %s1430_s16, %s1430_s16 }
  0x10   :  { %p1437_p8 = por %p1436_p7, %p1435_p6 }
  0x12   :  { %p1438_p9 = pnand %p1437_p8, %p1431_p5 }
  0x14   :  { %1441 = shalt.err (!%p1438_p9)
}
  0x15   :  { %s1470_s17 = smov 128   ;;  %s1471_s18 = smov 8  }
  0x16   :  { %31 = dma.hbm_to_vmem [thread:$0]  %s2066_s1, 16384, %s26_s12, [#allocation6], %s1470_s17, %s1470_s17, %s1471_s18  }
  0x17   :  { %1462 = dma.done.wait [#allocation3], 128  }
  0x18   :  { %1463 = vsyncadd [#allocation3], 4294967168 }
  0x19   :  { %1464 = dma.done.wait [#allocation6], 16384  }
  0x1a   :  { %1465 = vsyncadd [#allocation6], 4294950912  ;;  %v38_v0 = vld [vmem:[#allocation2] sm:$0xff]  ;;  %s1472_s21 = smov 64   ;;  %vm171_vm0 = vcmask 523264   ;;  %v40_v1 = vld [vmem:[#allocation5 + $0x8] sm:$0xff] }
  0x1b   :  { %168 = vrot.lane.b32.xlu0 %v38_v0, %s1472_s21  ;;  %v39_v2 = vld [vmem:[#allocation5] sm:$0xff]  ;;  %v41_v7 = vld [vmem:[#allocation5 + $0x10] sm:$0xff]  ;;  %v42_v11 = vld [vmem:[#allocation5 + $0x18] sm:$0xff]  ;;  %vm1199_vm1 = vcmask 1041409   ;;  %vm1201_vm2 = vcmask 1042434   ;;  %vm1203_vm3 = vcmask 1043459  }
  0x1c   :  { %v49_v8 = vld [vmem:[#allocation5 + $0x50] sm:$0xff]  ;;  %v55_v12 = vld [vmem:[#allocation5 + $0x80] sm:$0xff]  ;;  %v44_v19 = vld [vmem:[#allocation5 + $0x28] sm:$0xff]  ;;  %vm1205_vm4 = vcmask 1044484   ;;  %vm1207_vm5 = vcmask 1045509   ;;  %vm1209_vm6 = vcmask 1046534  }
  0x1d   :  { %v43_v15 = vld [vmem:[#allocation5 + $0x20] sm:$0xff]  ;;  %v52_v20 = vld [vmem:[#allocation5 + $0x68] sm:$0xff]  ;;  %v45_v23 = vld [vmem:[#allocation5 + $0x30] sm:$0xff]  ;;  %vm1211_vm7 = vcmask 1047559   ;;  %s1473_s0 = smov [#allocation7]  }
  0x1e   :  { %v51_v16 = vld [vmem:[#allocation5 + $0x60] sm:$0xff]  ;;  %v46_v27 = vld [vmem:[#allocation5 + $0x38] sm:$0xff]  ;;  %v53_v28 = vld [vmem:[#allocation5 + $0x70] sm:$0xff]  ;;  %s1382_s1 = sshll.u32 %s1473_s0, 4  ;;  %s1383_s1 = int_to_ptr.vmem [resolvable:$true] %s1382_s1 }
  0x1f   :  { %v63_v24 = vld [vmem:[#allocation5 + $0xc0] sm:$0xff]  ;;  %v65_v32 = vld [vmem:[#allocation5 + $0xd0] sm:$0xff]  ;;  %v48_v35 = vld [vmem:[#allocation5 + $0x48] sm:$0xff]  ;;  %s1442_s22 = scalar_lea.vmem %s1383_s1, 128  ;;  %p1447_p11 = scmp.lt.s32.totalorder %s1383_s1, %s1383_s1 }
  0x20   :  { %v47_v31 = vld [vmem:[#allocation5 + $0x40] sm:$0xff]  ;;  %v60_v36 = vld [vmem:[#allocation5 + $0xa8] sm:$0xff]  ;;  %v50_v39 = vld [vmem:[#allocation5 + $0x58] sm:$0xff]  ;;  %p1443_p10 = scmp.ne.s32.totalorder %s1383_s1, %s1442_s22  ;;  %p1448_p12 = scmp.lt.s32.totalorder %s1442_s22, %s1442_s22 }
  0x21   :  { %v71_v40 = vld [vmem:[#allocation5 + $0x100] sm:$0xff]  ;;  %v56_v43 = vld [vmem:[#allocation5 + $0x88] sm:$0xff]  ;;  %v61_v44 = vld [vmem:[#allocation5 + $0xb0] sm:$0xff] }
  0x22   :  { %v57_v47 = vld [vmem:[#allocation5 + $0x90] sm:$0xff]  ;;  %v58_v51 = vld [vmem:[#allocation5 + $0x98] sm:$0xff]  ;;  %v68_v52 = vld [vmem:[#allocation5 + $0xe8] sm:$0xff]  ;;  %p1449_p13 = por %p1448_p12, %p1447_p11 }
  0x23   :  { %v73_v48 = vld [vmem:[#allocation5 + $0x110] sm:$0xff]  ;;  %v64_v55 = vld [vmem:[#allocation5 + $0xc8] sm:$0xff]  ;;  %v79_v56 = vld [vmem:[#allocation5 + $0x140] sm:$0xff] }
  0x24   :  { %v59_v59 = vld [vmem:[#allocation5 + $0xa0] sm:$0xff]  ;;  %v69_v60 = vld [vmem:[#allocation5 + $0xf0] sm:$0xff]  ;;  %v54_v63 = vld [vmem:[#allocation5 + $0x78] sm:$0xff]  ;;  %p1450_p0 = pnand %p1449_p13, %p1443_p10 }
  0x8d   :  { %v169_v3 = vpop.permute.xlu0 %168 }
  0x8e   :  { %v1495_v4 = vsel %vm171_vm0, %v38_v0, %v169_v3  ;;  %v81_v0 = vld [vmem:[#allocation5 + $0x150] sm:$0xff]  ;;  %v66_v3 = vld [vmem:[#allocation5 + $0xd8] sm:$0xff] }
  0x8f   :  { %v174_v5 = vmul.f32 %v1495_v4, %v40_v1  ;;  %v173_v6 = vmul.f32 %v1495_v4, %v39_v2  ;;  %v175_v9 = vmul.f32 %v1495_v4, %v41_v7  ;;  %v183_v10 = vmul.f32 %v1495_v4, %v49_v8  ;;  %v72_v8 = vld [vmem:[#allocation5 + $0x108] sm:$0xff] }
  0x90   :  { %v176_v13 = vmul.f32 %v1495_v4, %v42_v11  ;;  %v189_v14 = vmul.f32 %v1495_v4, %v55_v12  ;;  %v177_v17 = vmul.f32 %v1495_v4, %v43_v15  ;;  %v185_v18 = vmul.f32 %v1495_v4, %v51_v16  ;;  %v67_v12 = vld [vmem:[#allocation5 + $0xe0] sm:$0xff]  ;;  %v62_v16 = vld [vmem:[#allocation5 + $0xb8] sm:$0xff] }
  0x91   :  { %303 = vadd.xlane.f32.xlu1 %v174_v5  ;;  %301 = vadd.xlane.f32.xlu0 %v173_v6  ;;  %v178_v21 = vmul.f32 %v1495_v4, %v44_v19  ;;  %v186_v22 = vmul.f32 %v1495_v4, %v52_v20  ;;  %v179_v25 = vmul.f32 %v1495_v4, %v45_v23  ;;  %v76_v5 = vld [vmem:[#allocation5 + $0x128] sm:$0xff]  ;;  %v74_v20 = vld [vmem:[#allocation5 + $0x118] sm:$0xff] }
  0x92   :  { %v197_v26 = vmul.f32 %v1495_v4, %v63_v24  ;;  %v180_v29 = vmul.f32 %v1495_v4, %v46_v27  ;;  %v187_v30 = vmul.f32 %v1495_v4, %v53_v28  ;;  %v181_v33 = vmul.f32 %v1495_v4, %v47_v31  ;;  %v80_v24 = vld [vmem:[#allocation5 + $0x148] sm:$0xff]  ;;  %v75_v28 = vld [vmem:[#allocation5 + $0x120] sm:$0xff] }
  0x93   :  { %v199_v34 = vmul.f32 %v1495_v4, %v65_v32  ;;  %v182_v37 = vmul.f32 %v1495_v4, %v48_v35  ;;  %v194_v38 = vmul.f32 %v1495_v4, %v60_v36  ;;  %v184_v41 = vmul.f32 %v1495_v4, %v50_v39  ;;  %v70_v32 = vld [vmem:[#allocation5 + $0xf8] sm:$0xff] }
  0x94   :  { %v205_v42 = vmul.f32 %v1495_v4, %v71_v40  ;;  %v190_v45 = vmul.f32 %v1495_v4, %v56_v43  ;;  %v195_v46 = vmul.f32 %v1495_v4, %v61_v44  ;;  %v191_v49 = vmul.f32 %v1495_v4, %v57_v47  ;;  %v82_v36 = vld [vmem:[#allocation5 + $0x158] sm:$0xff]  ;;  %v88_v40 = vld [vmem:[#allocation5 + $0x188] sm:$0xff]  ;;  %v83_v44 = vld [vmem:[#allocation5 + $0x160] sm:$0xff] }
  0x95   :  { %305 = vadd.xlane.f32.xlu1 %v175_v9  ;;  %321 = vadd.xlane.f32.xlu0 %v183_v10  ;;  %v207_v50 = vmul.f32 %v1495_v4, %v73_v48  ;;  %v192_v53 = vmul.f32 %v1495_v4, %v58_v51  ;;  %v202_v54 = vmul.f32 %v1495_v4, %v68_v52  ;;  %v87_v9 = vld [vmem:[#allocation5 + $0x180] sm:$0xff]  ;;  %v78_v48 = vld [vmem:[#allocation5 + $0x138] sm:$0xff] }
  0x96   :  { %v198_v57 = vmul.f32 %v1495_v4, %v64_v55  ;;  %v213_v58 = vmul.f32 %v1495_v4, %v79_v56  ;;  %v193_v61 = vmul.f32 %v1495_v4, %v59_v59  ;;  %v203_v62 = vmul.f32 %v1495_v4, %v69_v60  ;;  %v90_v52 = vld [vmem:[#allocation5 + $0x198] sm:$0xff]  ;;  %v96_v56 = vld [vmem:[#allocation5 + $0x1c8] sm:$0xff]  ;;  %v91_v60 = vld [vmem:[#allocation5 + $0x1a0] sm:$0xff] }
  0x97   :  { %v188_v1 = vmul.f32 %v1495_v4, %v54_v63  ;;  %v215_v2 = vmul.f32 %v1495_v4, %v81_v0  ;;  %v200_v6 = vmul.f32 %v1495_v4, %v66_v3  ;;  %v210_v7 = vmul.f32 %v1495_v4, %v76_v5  ;;  %v86_v0 = vld [vmem:[#allocation5 + $0x178] sm:$0xff] }
  0x98   :  { %v206_v10 = vmul.f32 %v1495_v4, %v72_v8  ;;  %v221_v11 = vmul.f32 %v1495_v4, %v87_v9  ;;  %v98_v5 = vld [vmem:[#allocation5 + $0x1d8] sm:$0xff]  ;;  %v685_v9 = vlaneseq }
  0x99   :  { %307 = vadd.xlane.f32.xlu1 %v176_v13  ;;  %333 = vadd.xlane.f32.xlu0 %v189_v14  ;;  %v77_v13 = vld [vmem:[#allocation5 + $0x130] sm:$0xff]  ;;  %v201_v14 = vmul.f32 %v1495_v4, %v67_v12 }
  0x9a   :  { %v211_v15 = vmul.f32 %v1495_v4, %v77_v13 }
  0x9d   :  { %309 = vadd.xlane.f32.xlu1 %v177_v17  ;;  %325 = vadd.xlane.f32.xlu0 %v185_v18  ;;  %v89_v17 = vld [vmem:[#allocation5 + $0x190] sm:$0xff]  ;;  %v196_v18 = vmul.f32 %v1495_v4, %v62_v16  ;;  %v99_v16 = vld [vmem:[#allocation5 + $0x1e0] sm:$0xff] }
  0x9e   :  { %v223_v19 = vmul.f32 %v1495_v4, %v89_v17  ;;  %v109_v17 = vld [vmem:[#allocation5 + $0x230] sm:$0xff] }
  0xa1   :  { %311 = vadd.xlane.f32.xlu1 %v178_v21  ;;  %327 = vadd.xlane.f32.xlu0 %v186_v22  ;;  %v84_v21 = vld [vmem:[#allocation5 + $0x168] sm:$0xff]  ;;  %v208_v22 = vmul.f32 %v1495_v4, %v74_v20 }
  0xa2   :  { %v218_v23 = vmul.f32 %v1495_v4, %v84_v21  ;;  %v94_v21 = vld [vmem:[#allocation5 + $0x1b8] sm:$0xff] }
  0xa5   :  { %313 = vadd.xlane.f32.xlu1 %v179_v25  ;;  %349 = vadd.xlane.f32.xlu0 %v197_v26  ;;  %v95_v25 = vld [vmem:[#allocation5 + $0x1c0] sm:$0xff]  ;;  %v214_v26 = vmul.f32 %v1495_v4, %v80_v24 }
  0xa6   :  { %v229_v27 = vmul.f32 %v1495_v4, %v95_v25 }
  0xa9   :  { %315 = vadd.xlane.f32.xlu1 %v180_v29  ;;  %329 = vadd.xlane.f32.xlu0 %v187_v30  ;;  %v85_v29 = vld [vmem:[#allocation5 + $0x170] sm:$0xff]  ;;  %v209_v30 = vmul.f32 %v1495_v4, %v75_v28 }
  0xaa   :  { %v219_v31 = vmul.f32 %v1495_v4, %v85_v29  ;;  %v106_v29 = vld [vmem:[#allocation5 + $0x218] sm:$0xff] }
  0xad   :  { %317 = vadd.xlane.f32.xlu1 %v181_v33  ;;  %353 = vadd.xlane.f32.xlu0 %v199_v34  ;;  %v97_v33 = vld [vmem:[#allocation5 + $0x1d0] sm:$0xff]  ;;  %v204_v34 = vmul.f32 %v1495_v4, %v70_v32 }
  0xae   :  { %v231_v35 = vmul.f32 %v1495_v4, %v97_v33 }
  0xb1   :  { %319 = vadd.xlane.f32.xlu1 %v182_v37  ;;  %343 = vadd.xlane.f32.xlu0 %v194_v38  ;;  %v92_v37 = vld [vmem:[#allocation5 + $0x1a8] sm:$0xff]  ;;  %v216_v38 = vmul.f32 %v1495_v4, %v82_v36 }
  0xb2   :  { %v226_v39 = vmul.f32 %v1495_v4, %v92_v37  ;;  %v112_v37 = vld [vmem:[#allocation5 + $0x248] sm:$0xff] }
  0xb5   :  { %323 = vadd.xlane.f32.xlu1 %v184_v41  ;;  %365 = vadd.xlane.f32.xlu0 %v205_v42  ;;  %v103_v41 = vld [vmem:[#allocation5 + $0x200] sm:$0xff]  ;;  %v222_v42 = vmul.f32 %v1495_v4, %v88_v40 }
  0xb6   :  { %v237_v43 = vmul.f32 %v1495_v4, %v103_v41 }
  0xb9   :  { %335 = vadd.xlane.f32.xlu1 %v190_v45  ;;  %345 = vadd.xlane.f32.xlu0 %v195_v46  ;;  %v93_v45 = vld [vmem:[#allocation5 + $0x1b0] sm:$0xff]  ;;  %v217_v46 = vmul.f32 %v1495_v4, %v83_v44 }
  0xba   :  { %v227_v47 = vmul.f32 %v1495_v4, %v93_v45  ;;  %v107_v45 = vld [vmem:[#allocation5 + $0x220] sm:$0xff] }
  0xbd   :  { %337 = vadd.xlane.f32.xlu1 %v191_v49  ;;  %369 = vadd.xlane.f32.xlu0 %v207_v50  ;;  %v105_v49 = vld [vmem:[#allocation5 + $0x210] sm:$0xff]  ;;  %v212_v50 = vmul.f32 %v1495_v4, %v78_v48 }
  0xbe   :  { %v239_v51 = vmul.f32 %v1495_v4, %v105_v49 }
  0xc1   :  { %339 = vadd.xlane.f32.xlu1 %v192_v53  ;;  %359 = vadd.xlane.f32.xlu0 %v202_v54  ;;  %v100_v53 = vld [vmem:[#allocation5 + $0x1e8] sm:$0xff]  ;;  %v224_v54 = vmul.f32 %v1495_v4, %v90_v52 }
  0xc2   :  { %v234_v55 = vmul.f32 %v1495_v4, %v100_v53  ;;  %v102_v53 = vld [vmem:[#allocation5 + $0x1f8] sm:$0xff] }
  0xc5   :  { %351 = vadd.xlane.f32.xlu1 %v198_v57  ;;  %381 = vadd.xlane.f32.xlu0 %v213_v58  ;;  %v111_v57 = vld [vmem:[#allocation5 + $0x240] sm:$0xff]  ;;  %v230_v58 = vmul.f32 %v1495_v4, %v96_v56 }
  0xc6   :  { %v245_v59 = vmul.f32 %v1495_v4, %v111_v57 }
  0xc9   :  { %341 = vadd.xlane.f32.xlu1 %v193_v61  ;;  %361 = vadd.xlane.f32.xlu0 %v203_v62  ;;  %v101_v61 = vld [vmem:[#allocation5 + $0x1f0] sm:$0xff]  ;;  %v225_v62 = vmul.f32 %v1495_v4, %v91_v60 }
  0xca   :  { %v235_v63 = vmul.f32 %v1495_v4, %v101_v61  ;;  %v114_v61 = vld [vmem:[#allocation5 + $0x258] sm:$0xff] }
  0xcd   :  { %331 = vadd.xlane.f32.xlu1 %v188_v1  ;;  %385 = vadd.xlane.f32.xlu0 %v215_v2  ;;  %v113_v1 = vld [vmem:[#allocation5 + $0x250] sm:$0xff]  ;;  %v220_v2 = vmul.f32 %v1495_v4, %v86_v0 }
  0xce   :  { %v247_v3 = vmul.f32 %v1495_v4, %v113_v1 }
  0xd1   :  { %355 = vadd.xlane.f32.xlu1 %v200_v6  ;;  %375 = vadd.xlane.f32.xlu0 %v210_v7  ;;  %v108_v6 = vld [vmem:[#allocation5 + $0x228] sm:$0xff]  ;;  %v232_v7 = vmul.f32 %v1495_v4, %v98_v5 }
  0xd2   :  { %v242_v8 = vmul.f32 %v1495_v4, %v108_v6  ;;  %v120_v6 = vld [vmem:[#allocation5 + $0x288] sm:$0xff] }
  0xd5   :  { %367 = vadd.xlane.f32.xlu1 %v206_v10  ;;  %397 = vadd.xlane.f32.xlu0 %v221_v11  ;;  %v104_v10 = vld [vmem:[#allocation5 + $0x208] sm:$0xff]  ;;  %v119_v11 = vld [vmem:[#allocation5 + $0x280] sm:$0xff] }
  0xd6   :  { %v238_v12 = vmul.f32 %v1495_v4, %v104_v10  ;;  %v253_v13 = vmul.f32 %v1495_v4, %v119_v11 }
  0xd9   :  { %357 = vadd.xlane.f32.xlu1 %v201_v14  ;;  %377 = vadd.xlane.f32.xlu0 %v211_v15  ;;  %v686_v14 = vand.u32 127, %v685_v9  ;;  %v688_v15 = vshrl.u32 %v685_v9, 7 }
  0xdb   :  { %v1567_v20 = vsub.s32 %v686_v14, %v688_v15  ;;  %v115_v14 = vld [vmem:[#allocation5 + $0x260] sm:$0xff]  ;;  %v125_v15 = vld [vmem:[#allocation5 + $0x2b0] sm:$0xff] }
  0xdd   :  { %347 = vadd.xlane.f32.xlu1 %v196_v18  ;;  %401 = vadd.xlane.f32.xlu0 %v223_v19  ;;  %v233_v18 = vmul.f32 %v1495_v4, %v99_v16  ;;  %v243_v19 = vmul.f32 %v1495_v4, %v109_v17 }
  0xe1   :  { %371 = vadd.xlane.f32.xlu1 %v208_v22  ;;  %391 = vadd.xlane.f32.xlu0 %v218_v23  ;;  %v121_v22 = vld [vmem:[#allocation5 + $0x290] sm:$0xff] }
  0xe2   :  { %v255_v28 = vmul.f32 %v1495_v4, %v121_v22  ;;  %v110_v22 = vld [vmem:[#allocation5 + $0x238] sm:$0xff] }
  0xe5   :  { %383 = vadd.xlane.f32.xlu1 %v214_v26  ;;  %413 = vadd.xlane.f32.xlu0 %v229_v27  ;;  %v228_v27 = vmul.f32 %v1495_v4, %v94_v21  ;;  %v259_v21 = vmul.f32 %v1495_v4, %v125_v15 }
  0xe9   :  { %373 = vadd.xlane.f32.xlu1 %v209_v30  ;;  %393 = vadd.xlane.f32.xlu0 %v219_v31  ;;  %v116_v30 = vld [vmem:[#allocation5 + $0x268] sm:$0xff] }
  0xea   :  { %v250_v36 = vmul.f32 %v1495_v4, %v116_v30 }
  0xed   :  { %363 = vadd.xlane.f32.xlu1 %v204_v34  ;;  %417 = vadd.xlane.f32.xlu0 %v231_v35  ;;  %v240_v35 = vmul.f32 %v1495_v4, %v106_v29 }
  0xf1   :  { %387 = vadd.xlane.f32.xlu1 %v216_v38  ;;  %407 = vadd.xlane.f32.xlu0 %v226_v39  ;;  %v127_v38 = vld [vmem:[#allocation5 + $0x2c0] sm:$0xff] }
  0xf2   :  { %v261_v44 = vmul.f32 %v1495_v4, %v127_v38 }
  0xf5   :  { %399 = vadd.xlane.f32.xlu1 %v222_v42  ;;  %429 = vadd.xlane.f32.xlu0 %v237_v43  ;;  %v246_v43 = vmul.f32 %v1495_v4, %v112_v37 }
  0xf9   :  { %389 = vadd.xlane.f32.xlu1 %v217_v46  ;;  %409 = vadd.xlane.f32.xlu0 %v227_v47  ;;  %v117_v46 = vld [vmem:[#allocation5 + $0x270] sm:$0xff] }
  0xfa   :  { %v251_v52 = vmul.f32 %v1495_v4, %v117_v46 }
  0xfd   :  { %379 = vadd.xlane.f32.xlu1 %v212_v50  ;;  %433 = vadd.xlane.f32.xlu0 %v239_v51  ;;  %v241_v51 = vmul.f32 %v1495_v4, %v107_v45 }
 0x101   :  { %403 = vadd.xlane.f32.xlu1 %v224_v54  ;;  %423 = vadd.xlane.f32.xlu0 %v234_v55  ;;  %v129_v54 = vld [vmem:[#allocation5 + $0x2d0] sm:$0xff] }
 0x102   :  { %v263_v60 = vmul.f32 %v1495_v4, %v129_v54 }
 0x105   :  { %415 = vadd.xlane.f32.xlu1 %v230_v58  ;;  %445 = vadd.xlane.f32.xlu0 %v245_v59  ;;  %v236_v59 = vmul.f32 %v1495_v4, %v102_v53 }
 0x109   :  { %405 = vadd.xlane.f32.xlu1 %v225_v62  ;;  %425 = vadd.xlane.f32.xlu0 %v235_v63  ;;  %v124_v62 = vld [vmem:[#allocation5 + $0x2a8] sm:$0xff] }
 0x10a   :  { %v258_v5 = vmul.f32 %v1495_v4, %v124_v62 }
 0x10d   :  { %395 = vadd.xlane.f32.xlu1 %v220_v2  ;;  %449 = vadd.xlane.f32.xlu0 %v247_v3  ;;  %v248_v3 = vmul.f32 %v1495_v4, %v114_v61 }
 0x111   :  { %419 = vadd.xlane.f32.xlu1 %v232_v7  ;;  %439 = vadd.xlane.f32.xlu0 %v242_v8  ;;  %v135_v7 = vld [vmem:[#allocation5 + $0x300] sm:$0xff] }
 0x115   :  { %431 = vadd.xlane.f32.xlu1 %v238_v12  ;;  %461 = vadd.xlane.f32.xlu0 %v253_v13  ;;  %v254_v12 = vmul.f32 %v1495_v4, %v120_v6  ;;  %v269_v13 = vmul.f32 %v1495_v4, %v135_v7 }
 0x119   :  { %421 = vadd.xlane.f32.xlu1 %v233_v18  ;;  %441 = vadd.xlane.f32.xlu0 %v243_v19  ;;  %v249_v19 = vmul.f32 %v1495_v4, %v115_v14 }
 0x11a   :  { %v304_v23 = vpop.xlane.xlu1 %303  ;;  %v302_v24 = vpop.xlane.xlu0 %301 }
 0x11b   :  { %v694_v25 = vrot.slane %v304_v23, %v1567_v20  ;;  %v690_v26 = vrot.slane %v302_v24, %v1567_v20  ;;  %v137_v23 = vld [vmem:[#allocation5 + $0x310] sm:$0xff] }
 0x11c   :  { %v271_v29 = vmul.f32 %v1495_v4, %v137_v23  ;;  %v151_v23 = vld [vmem:[#allocation5 + $0x380] sm:$0xff] }
 0x11d   :  { %v1200_v31 = vsel %vm1199_vm1, %v694_v25, %v690_v26  ;;  %411 = vadd.xlane.f32.xlu1 %v228_v27  ;;  %465 = vadd.xlane.f32.xlu0 %v255_v28  ;;  %v244_v28 = vmul.f32 %v1495_v4, %v110_v22  ;;  %v136_v22 = vld [vmem:[#allocation5 + $0x308] sm:$0xff] }
 0x11e   :  { %v306_v32 = vpop.xlane.xlu1 %305  ;;  %v1574_v33 = vpop.xlane.xlu0 %321 }
 0x11f   :  { %v698_v34 = vrot.slane %v306_v32, %v1567_v20  ;;  %v730_v30 = vrot.slane %v1574_v33, %v1567_v20  ;;  %v132_v32 = vld [vmem:[#allocation5 + $0x2e8] sm:$0xff] }
 0x121   :  { %v1202_v39 = vsel %vm1201_vm2, %v698_v34, %v1200_v31  ;;  %435 = vadd.xlane.f32.xlu1 %v240_v35  ;;  %455 = vadd.xlane.f32.xlu0 %v250_v36  ;;  %v122_v31 = vld [vmem:[#allocation5 + $0x298] sm:$0xff] }
 0x122   :  { %v308_v40 = vpop.xlane.xlu1 %307  ;;  %v1580_v41 = vpop.xlane.xlu0 %333 }
 0x123   :  { %v702_v42 = vrot.slane %v308_v40, %v1567_v20  ;;  %v266_v40 = vmul.f32 %v1495_v4, %v132_v32  ;;  %v141_v32 = vld [vmem:[#allocation5 + $0x330] sm:$0xff] }
 0x125   :  { %v1204_v47 = vsel %vm1203_vm3, %v702_v42, %v1202_v39  ;;  %447 = vadd.xlane.f32.xlu1 %v246_v43  ;;  %477 = vadd.xlane.f32.xlu0 %v261_v44  ;;  %v256_v39 = vmul.f32 %v1495_v4, %v122_v31  ;;  %v128_v42 = vld [vmem:[#allocation5 + $0x2c8] sm:$0xff]  ;;  %v143_v43 = vld [vmem:[#allocation5 + $0x340] sm:$0xff] }
 0x126   :  { %v310_v48 = vpop.xlane.xlu1 %309  ;;  %v1586_v49 = vpop.xlane.xlu0 %325  ;;  %v277_v53 = vmul.f32 %v1495_v4, %v143_v43  ;;  %v131_v31 = vld [vmem:[#allocation5 + $0x2e0] sm:$0xff]  ;;  %v126_v43 = vld [vmem:[#allocation5 + $0x2b8] sm:$0xff] }
 0x127   :  { %v706_v50 = vrot.slane %v310_v48, %v1567_v20  ;;  %v738_v33 = vrot.slane %v1586_v49, %v1567_v20  ;;  %v754_v49 = vrot.slane %v1580_v41, %v1567_v20 }
 0x129   :  { %v1206_v55 = vsel %vm1205_vm4, %v706_v50, %v1204_v47  ;;  %437 = vadd.xlane.f32.xlu1 %v241_v51  ;;  %457 = vadd.xlane.f32.xlu0 %v251_v52  ;;  %v262_v50 = vmul.f32 %v1495_v4, %v128_v42  ;;  %v265_v42 = vmul.f32 %v1495_v4, %v131_v31 }
 0x12a   :  { %v312_v56 = vpop.xlane.xlu1 %311  ;;  %v1592_v57 = vpop.xlane.xlu0 %327 }
 0x12b   :  { %v710_v58 = vrot.slane %v312_v56, %v1567_v20  ;;  %v742_v44 = vrot.slane %v1592_v57, %v1567_v20  ;;  %v133_v56 = vld [vmem:[#allocation5 + $0x2f0] sm:$0xff] }
 0x12c   :  { %v267_v62 = vmul.f32 %v1495_v4, %v133_v56 }
 0x12d   :  { %427 = vadd.xlane.f32.xlu1 %v236_v59  ;;  %481 = vadd.xlane.f32.xlu0 %v263_v60  ;;  %v1208_v63 = vsel %vm1207_vm5, %v710_v58, %v1206_v55  ;;  %v123_v55 = vld [vmem:[#allocation5 + $0x2a0] sm:$0xff] }
 0x12e   :  { %v314_v0 = vpop.xlane.xlu1 %313  ;;  %v1598_v1 = vpop.xlane.xlu0 %349  ;;  %v257_v41 = vmul.f32 %v1495_v4, %v123_v55 }
 0x12f   :  { %v714_v2 = vrot.slane %v314_v0, %v1567_v20  ;;  %v145_v0 = vld [vmem:[#allocation5 + $0x350] sm:$0xff]  ;;  %v786_v14 = vrot.slane %v1598_v1, %v1567_v20 }
 0x131   :  { %451 = vadd.xlane.f32.xlu1 %v248_v3  ;;  %471 = vadd.xlane.f32.xlu0 %v258_v5  ;;  %v1210_v8 = vsel %vm1209_vm6, %v714_v2, %v1208_v63  ;;  %v118_v63 = vld [vmem:[#allocation5 + $0x278] sm:$0xff] }
 0x132   :  { %v316_v9 = vpop.xlane.xlu1 %315  ;;  %v330_v10 = vpop.xlane.xlu0 %329  ;;  %v252_v7 = vmul.f32 %v1495_v4, %v118_v63 }
 0x133   :  { %v718_v11 = vrot.slane %v316_v9, %v1567_v20  ;;  %v746_v46 = vrot.slane %v330_v10, %v1567_v20  ;;  %v130_v9 = vld [vmem:[#allocation5 + $0x2d8] sm:$0xff]  ;;  %v140_v10 = vld [vmem:[#allocation5 + $0x328] sm:$0xff] }
 0x135   :  { %463 = vadd.xlane.f32.xlu1 %v254_v12  ;;  %493 = vadd.xlane.f32.xlu0 %v269_v13  ;;  %v1608_v16 = vsel %vm1211_vm7, %v718_v11, %v1210_v8  ;;  %v279_v8 = vmul.f32 %v1495_v4, %v145_v0 }
 0x136   :  { %v318_v17 = vpop.xlane.xlu1 %317  ;;  %v1610_v18 = vpop.xlane.xlu0 %353 }
 0x137   :  { %v722_v26 = vrot.slane %v318_v17, %v1567_v20  ;;  %v264_v17 = vmul.f32 %v1495_v4, %v130_v9 }
 0x139   :  { %453 = vadd.xlane.f32.xlu1 %v249_v19  ;;  %473 = vadd.xlane.f32.xlu0 %v259_v21  ;;  %v274_v19 = vmul.f32 %v1495_v4, %v140_v10  ;;  %v794_v21 = vrot.slane %v1610_v18, %v1567_v20 }
 0x13a   :  { %v320_v24 = vpop.xlane.xlu1 %319  ;;  %v1614_v25 = vpop.xlane.xlu0 %343 }
 0x13b   :  { %v726_v27 = vrot.slane %v320_v24, %v1567_v20  ;;  %v774_v18 = vrot.slane %v1614_v25, %v1567_v20  ;;  %v275_v25 = vmul.f32 %v1495_v4, %v141_v32 }
 0x13d   :  { %v1213_v34 = vsel %vm1199_vm1, %v726_v27, %v722_v26  ;;  %443 = vadd.xlane.f32.xlu1 %v244_v28  ;;  %497 = vadd.xlane.f32.xlu0 %v271_v29  ;;  %v270_v29 = vmul.f32 %v1495_v4, %v136_v22 }
 0x13e   :  { %v324_v35 = vpop.xlane.xlu1 %323  ;;  %v1214_v36 = vsel %vm1201_vm2, %v730_v30, %v1213_v34  ;;  %v1624_v37 = vpop.xlane.xlu0 %365  ;;  %v285_v30 = vmul.f32 %v1495_v4, %v151_v23 }
 0x13f   :  { %v734_v38 = vrot.slane %v324_v35, %v1567_v20  ;;  %v818_v56 = vrot.slane %v1624_v37, %v1567_v20 }
 0x141   :  { %v1215_v45 = vsel %vm1203_vm3, %v734_v38, %v1214_v36  ;;  %467 = vadd.xlane.f32.xlu1 %v256_v39  ;;  %487 = vadd.xlane.f32.xlu0 %v266_v40 }
 0x142   :  { %v336_v47 = vpop.xlane.xlu1 %335  ;;  %v1635_v48 = vpop.xlane.xlu0 %345  ;;  %v1216_v51 = vsel %vm1205_vm4, %v738_v33, %v1215_v45 }
 0x143   :  { %v758_v52 = vrot.slane %v336_v47, %v1567_v20  ;;  %v1217_v54 = vsel %vm1207_vm5, %v742_v44, %v1216_v51  ;;  %v778_v34 = vrot.slane %v1635_v48, %v1567_v20  ;;  %v153_v44 = vld [vmem:[#allocation5 + $0x390] sm:$0xff] }
 0x144   :  { %v1218_v57 = vsel %vm1209_vm6, %v746_v46, %v1217_v54  ;;  %v287_v51 = vmul.f32 %v1495_v4, %v153_v44 }
 0x145   :  { %v1220_v58 = vsel %vm1199_vm1, %v758_v52, %v754_v49  ;;  %479 = vadd.xlane.f32.xlu1 %v262_v50  ;;  %509 = vadd.xlane.f32.xlu0 %v277_v53  ;;  %v260_v50 = vmul.f32 %v1495_v4, %v126_v43  ;;  %v138_v49 = vld [vmem:[#allocation5 + $0x318] sm:$0xff]  ;;  %v148_v52 = vld [vmem:[#allocation5 + $0x368] sm:$0xff] }
 0x146   :  { %v338_v59 = vpop.xlane.xlu1 %337  ;;  %v1646_v60 = vpop.xlane.xlu0 %369 }
 0x147   :  { %v762_v61 = vrot.slane %v338_v59, %v1567_v20  ;;  %v282_v59 = vmul.f32 %v1495_v4, %v148_v52 }
 0x149   :  { %v1221_v2 = vsel %vm1201_vm2, %v762_v61, %v1220_v58  ;;  %469 = vadd.xlane.f32.xlu1 %v257_v41  ;;  %489 = vadd.xlane.f32.xlu0 %v267_v62  ;;  %v272_v58 = vmul.f32 %v1495_v4, %v138_v49  ;;  %v144_v61 = vld [vmem:[#allocation5 + $0x348] sm:$0xff]  ;;  %v159_v41 = vld [vmem:[#allocation5 + $0x3c0] sm:$0xff]  ;;  %v158_v49 = vld [vmem:[#allocation5 + $0x3b8] sm:$0xff] }
 0x14a   :  { %v340_v3 = vpop.xlane.xlu1 %339  ;;  %v1652_v5 = vpop.xlane.xlu0 %359  ;;  %v293_v37 = vmul.f32 %v1495_v4, %v159_v41 }
 0x14b   :  { %v766_v6 = vrot.slane %v340_v3, %v1567_v20  ;;  %v278_v3 = vmul.f32 %v1495_v4, %v144_v61 }
 0x14d   :  { %v1222_v11 = vsel %vm1203_vm3, %v766_v6, %v1221_v2  ;;  %459 = vadd.xlane.f32.xlu1 %v252_v7  ;;  %513 = vadd.xlane.f32.xlu0 %v279_v8  ;;  %v806_v6 = vrot.slane %v1652_v5, %v1567_v20  ;;  %v139_v7 = vld [vmem:[#allocation5 + $0x320] sm:$0xff]  ;;  %v149_v8 = vld [vmem:[#allocation5 + $0x370] sm:$0xff] }
 0x14e   :  { %v352_v12 = vpop.xlane.xlu1 %351  ;;  %v1658_v13 = vpop.xlane.xlu0 %381 }
 0x14f   :  { %v790_v15 = vrot.slane %v352_v12, %v1567_v20 }
 0x151   :  { %v1227_v24 = vsel %vm1199_vm1, %v790_v15, %v786_v14  ;;  %483 = vadd.xlane.f32.xlu1 %v264_v17  ;;  %503 = vadd.xlane.f32.xlu0 %v274_v19  ;;  %v273_v15 = vmul.f32 %v1495_v4, %v139_v7  ;;  %v283_v17 = vmul.f32 %v1495_v4, %v149_v8  ;;  %v134_v19 = vld [vmem:[#allocation5 + $0x2f8] sm:$0xff]  ;;  %v160_v7 = vld [vmem:[#allocation5 + $0x3c8] sm:$0xff] }
 0x152   :  { %v342_v26 = vpop.xlane.xlu1 %341  ;;  %v1668_v27 = vpop.xlane.xlu0 %361  ;;  %v1228_v1 = vsel %vm1201_vm2, %v794_v21, %v1227_v24  ;;  %v161_v21 = vld [vmem:[#allocation5 + $0x3d0] sm:$0xff]  ;;  %v268_v24 = vmul.f32 %v1495_v4, %v134_v19 }
 0x153   :  { %v770_v28 = vrot.slane %v342_v26, %v1567_v20  ;;  %v810_v9 = vrot.slane %v1668_v27, %v1567_v20  ;;  %v295_v26 = vmul.f32 %v1495_v4, %v161_v21  ;;  %v146_v27 = vld [vmem:[#allocation5 + $0x358] sm:$0xff] }
 0x154   :  { %v280_v31 = vmul.f32 %v1495_v4, %v146_v27  ;;  %v150_v21 = vld [vmem:[#allocation5 + $0x378] sm:$0xff] }
 0x155   :  { %v1223_v35 = vsel %vm1205_vm4, %v770_v28, %v1222_v11  ;;  %495 = vadd.xlane.f32.xlu1 %v270_v29  ;;  %525 = vadd.xlane.f32.xlu0 %v285_v30  ;;  %v850_v30 = vrot.slane %v1658_v13, %v1567_v20  ;;  %v162_v27 = vld [vmem:[#allocation5 + $0x3d8] sm:$0xff] }
 0x156   :  { %v332_v36 = vpop.xlane.xlu1 %331  ;;  %v1679_v38 = vpop.xlane.xlu0 %385  ;;  %v1224_v39 = vsel %vm1207_vm5, %v774_v18, %v1223_v35 }
 0x157   :  { %v750_v40 = vrot.slane %v332_v36, %v1567_v20  ;;  %v1686_v33 = vsel %vm1209_vm6, %v778_v34, %v1224_v39  ;;  %v858_v34 = vrot.slane %v1679_v38, %v1567_v20  ;;  %v152_v36 = vld [vmem:[#allocation5 + $0x388] sm:$0xff]  ;;  %v157_v39 = vld [vmem:[#allocation5 + $0x3b0] sm:$0xff] }
 0x159   :  { %485 = vadd.xlane.f32.xlu1 %v265_v42  ;;  %505 = vadd.xlane.f32.xlu0 %v275_v25  ;;  %v1689_v45 = vsel %vm1211_vm7, %v750_v40, %v1218_v57  ;;  %v826_v40 = vrot.slane %v1646_v60, %v1567_v20 }
 0x15a   :  { %v356_v46 = vpop.xlane.xlu1 %355  ;;  %v1691_v47 = vpop.xlane.xlu0 %375 }
 0x15b   :  { %v798_v48 = vrot.slane %v356_v46, %v1567_v20  ;;  %v286_v46 = vmul.f32 %v1495_v4, %v152_v36  ;;  %v838_v60 = vrot.slane %v1691_v47, %v1567_v20  ;;  %v142_v47 = vld [vmem:[#allocation5 + $0x338] sm:$0xff] }
 0x15d   :  { %v1229_v53 = vsel %vm1203_vm3, %v798_v48, %v1228_v1  ;;  %475 = vadd.xlane.f32.xlu1 %v260_v50  ;;  %529 = vadd.xlane.f32.xlu0 %v287_v51  ;;  %v156_v1 = vld [vmem:[#allocation5 + $0x3a8] sm:$0xff]  ;;  %v291_v48 = vmul.f32 %v1495_v4, %v157_v39  ;;  %v147_v51 = vld [vmem:[#allocation5 + $0x360] sm:$0xff] }
 0x15e   :  { %v368_v54 = vpop.xlane.xlu1 %367  ;;  %v1697_v55 = vpop.xlane.xlu0 %397  ;;  %v290_v32 = vmul.f32 %v1495_v4, %v156_v1 }
 0x15f   :  { %v822_v57 = vrot.slane %v368_v54, %v1567_v20 }
 0x161   :  { %v1234_v62 = vsel %vm1199_vm1, %v822_v57, %v818_v56  ;;  %499 = vadd.xlane.f32.xlu1 %v272_v58  ;;  %519 = vadd.xlane.f32.xlu0 %v282_v59  ;;  %v281_v57 = vmul.f32 %v1495_v4, %v147_v51  ;;  %v292_v58 = vmul.f32 %v1495_v4, %v158_v49  ;;  %v165_v59 = vld [vmem:[#allocation5 + $0x3f0] sm:$0xff] }
 0x162   :  { %v358_v63 = vpop.xlane.xlu1 %357  ;;  %v1705_v0 = vpop.xlane.xlu0 %377  ;;  %v1235_v44 = vsel %vm1201_vm2, %v826_v40, %v1234_v62  ;;  %v276_v62 = vmul.f32 %v1495_v4, %v142_v47 }
 0x163   :  { %v802_v2 = vrot.slane %v358_v63, %v1567_v20  ;;  %v299_v63 = vmul.f32 %v1495_v4, %v165_v59 }
 0x165   :  { %v1230_v10 = vsel %vm1205_vm4, %v802_v2, %v1229_v53  ;;  %511 = vadd.xlane.f32.xlu1 %v278_v3  ;;  %541 = vadd.xlane.f32.xlu0 %v293_v37  ;;  %v154_v2 = vld [vmem:[#allocation5 + $0x398] sm:$0xff] }
 0x166   :  { %v1715_v11 = vpop.xlane.xlu1 %347  ;;  %v1717_v12 = vpop.xlane.xlu0 %401  ;;  %v1231_v14 = vsel %vm1207_vm5, %v806_v6, %v1230_v10  ;;  %v288_v6 = vmul.f32 %v1495_v4, %v154_v2  ;;  %v294_v10 = vmul.f32 %v1495_v4, %v160_v7 }
 0x167   :  { %v1723_v5 = vsel %vm1209_vm6, %v810_v9, %v1231_v14  ;;  %v155_v14 = vld [vmem:[#allocation5 + $0x3a0] sm:$0xff] }
 0x168   :  { %v289_v19 = vmul.f32 %v1495_v4, %v155_v14 }
 0x169   :  { %501 = vadd.xlane.f32.xlu1 %v273_v15  ;;  %521 = vadd.xlane.f32.xlu0 %v283_v17 }
 0x16a   :  { %v372_v22 = vpop.xlane.xlu1 %371  ;;  %v1725_v23 = vpop.xlane.xlu0 %391 }
 0x16b   :  { %v830_v35 = vrot.slane %v372_v22, %v1567_v20 }
 0x16d   :  { %491 = vadd.xlane.f32.xlu1 %v268_v24  ;;  %545 = vadd.xlane.f32.xlu0 %v295_v26  ;;  %v1236_v50 = vsel %vm1203_vm3, %v830_v35, %v1235_v44  ;;  %v284_v26 = vmul.f32 %v1495_v4, %v150_v21  ;;  %v164_v35 = vld [vmem:[#allocation5 + $0x3e8] sm:$0xff] }
 0x16e   :  { %v384_v28 = vpop.xlane.xlu1 %383  ;;  %v1729_v29 = vpop.xlane.xlu0 %413  ;;  %v298_v40 = vmul.f32 %v1495_v4, %v164_v35 }
 0x16f   :  { %v854_v18 = vrot.slane %v384_v28, %v1567_v20 }
 0x171   :  { %v1241_v42 = vsel %vm1199_vm1, %v854_v18, %v850_v30  ;;  %515 = vadd.xlane.f32.xlu1 %v280_v31  ;;  %535 = vadd.xlane.f32.xlu0 %v290_v32  ;;  %v296_v30 = vmul.f32 %v1495_v4, %v162_v27  ;;  %v163_v18 = vld [vmem:[#allocation5 + $0x3e0] sm:$0xff] }
 0x172   :  { %v374_v13 = vpop.xlane.xlu1 %373  ;;  %v1742_v25 = vpop.xlane.xlu0 %393  ;;  %v1745_v43 = vsel %vm1201_vm2, %v858_v34, %v1241_v42  ;;  %v297_v34 = vmul.f32 %v1495_v4, %v163_v18  ;;  %v166_v42 = vld [vmem:[#allocation5 + $0x3f8] sm:$0xff] }
 0x173   :  { %v834_v38 = vrot.slane %v374_v13, %v1567_v20  ;;  %v874_v21 = vrot.slane %v1742_v25, %v1567_v20 }
 0x175   :  { %v1237_v52 = vsel %vm1205_vm4, %v834_v38, %v1236_v50  ;;  %527 = vadd.xlane.f32.xlu1 %v286_v46  ;;  %537 = vadd.xlane.f32.xlu0 %v291_v48  ;;  %v300_v38 = vmul.f32 %v1495_v4, %v166_v42  ;;  %v782_v4 = vrot.slane %v1715_v11, %v1567_v20 }
 0x176   :  { %v1755_v53 = vpop.xlane.xlu1 %363  ;;  %v1757_v54 = vpop.xlane.xlu0 %417  ;;  %v1760_v56 = vsel %vm1207_vm5, %v838_v60, %v1237_v52 }
 0x177   :  { %v1226_v11 = vsel %vm1211_vm7, %v782_v4, %v1686_v33 }
 0x179   :  { %517 = vadd.xlane.f32.xlu1 %v281_v57  ;;  %539 = vadd.xlane.f32.xlu0 %v292_v58 }
 0x17a   :  { %v1764_v61 = vpop.xlane.xlu1 %387  ;;  %v1766_v41 = vpop.xlane.xlu0 %407 }
 0x17b   :  { %v862_v59 = vrot.slane %v1764_v61, %v1567_v20  ;;  %v842_v61 = vrot.slane %v1705_v0, %v1567_v20 }
 0x17d   :  { %507 = vadd.xlane.f32.xlu1 %v276_v62  ;;  %553 = vadd.xlane.f32.xlu0 %v299_v63 }
 0x17e   :  { %v1770_v3 = vpop.xlane.xlu1 %399  ;;  %v1772_v37 = vpop.xlane.xlu0 %429 }
 0x17f   :  { %v886_v62 = vrot.slane %v1770_v3, %v1567_v20  ;;  %v890_v3 = vrot.slane %v1717_v12, %v1567_v20 }
 0x181   :  { %531 = vadd.xlane.f32.xlu1 %v288_v6 }
 0x182   :  { %v1775_v8 = vpop.xlane.xlu1 %389  ;;  %v1777_v9 = vpop.xlane.xlu0 %409 }
 0x183   :  { %v866_v63 = vrot.slane %v1775_v8, %v1567_v20 }
 0x185   :  { %543 = vadd.xlane.f32.xlu1 %v294_v10 }
 0x186   :  { %v1780_v15 = vpop.xlane.xlu1 %379  ;;  %v1782_v17 = vpop.xlane.xlu0 %433 }
 0x187   :  { %v846_v33 = vrot.slane %v1780_v15, %v1567_v20  ;;  %v914_v15 = vrot.slane %v1729_v29, %v1567_v20 }
 0x189   :  { %533 = vadd.xlane.f32.xlu1 %v289_v19 }
 0x18a   :  { %v1785_v22 = vpop.xlane.xlu1 %403  ;;  %v1787_v24 = vpop.xlane.xlu0 %423 }
 0x18d   :  { %523 = vadd.xlane.f32.xlu1 %v284_v26  ;;  %v1239_v26 = vsel %vm1209_vm6, %v842_v61, %v1760_v56  ;;  %v922_v56 = vrot.slane %v1757_v54, %v1567_v20 }
 0x18e   :  { %v1790_v1 = vpop.xlane.xlu1 %415  ;;  %v1792_v28 = vpop.xlane.xlu0 %445  ;;  %v1240_v27 = vsel %vm1211_vm7, %v846_v33, %v1239_v26 }
 0x18f   :  { %v918_v10 = vrot.slane %v1790_v1, %v1567_v20  ;;  %v978_v26 = vrot.slane %v1792_v28, %v1567_v20 }
 0x191   :  { %547 = vadd.xlane.f32.xlu1 %v296_v30  ;;  %v1255_v30 = vsel %vm1199_vm1, %v918_v10, %v914_v15 }
 0x192   :  { %v406_v31 = vpop.xlane.xlu1 %405  ;;  %v1795_v32 = vpop.xlane.xlu0 %425 }
 0x193   :  { %v898_v0 = vrot.slane %v406_v31, %v1567_v20  ;;  %v902_v31 = vrot.slane %v1766_v41, %v1567_v20 }
 0x195   :  { %549 = vadd.xlane.f32.xlu1 %v297_v34 }
 0x196   :  { %v1798_v36 = vpop.xlane.xlu1 %395  ;;  %v1800_v39 = vpop.xlane.xlu0 %449 }
 0x199   :  { %551 = vadd.xlane.f32.xlu1 %v298_v40  ;;  %v946_v40 = vrot.slane %v1772_v37, %v1567_v20  ;;  %v906_v37 = vrot.slane %v1777_v9, %v1567_v20 }
 0x19a   :  { %v1803_v13 = vpop.xlane.xlu1 %419  ;;  %v1805_v44 = vpop.xlane.xlu0 %439 }
 0x19b   :  { %v926_v25 = vrot.slane %v1803_v13, %v1567_v20  ;;  %v1256_v13 = vsel %vm1201_vm2, %v922_v56, %v1255_v30  ;;  %v966_v33 = vrot.slane %v1805_v44, %v1567_v20 }
 0x19d   :  { %555 = vadd.xlane.f32.xlu1 %v300_v38  ;;  %v1257_v41 = vsel %vm1203_vm3, %v926_v25, %v1256_v13 }
 0x19e   :  { %v432_v46 = vpop.xlane.xlu1 %431  ;;  %v1808_v48 = vpop.xlane.xlu0 %461 }
 0x19f   :  { %v950_v18 = vrot.slane %v432_v46, %v1567_v20 }
 0x1a1   :  { %v1262_v46 = vsel %vm1199_vm1, %v950_v18, %v946_v40 }
 0x1a2   :  { %v1810_v60 = vpop.xlane.xlu1 %421  ;;  %v1812_v50 = vpop.xlane.xlu0 %441 }
 0x1a3   :  { %v930_v34 = vrot.slane %v1810_v60, %v1567_v20 }
 0x1a6   :  { %v1814_v51 = vpop.xlane.xlu1 %411  ;;  %v1816_v49 = vpop.xlane.xlu0 %465 }
 0x1a7   :  { %v910_v60 = vrot.slane %v1814_v51, %v1567_v20  ;;  %v934_v51 = vrot.slane %v1787_v24, %v1567_v20 }
 0x1aa   :  { %v1818_v52 = vpop.xlane.xlu1 %435  ;;  %1334 = vxpose.xlu0.b32.start [1/16] (narrow) %v1608_v16, 8  ;;  %v1821_v57 = vpop.xlane.xlu0 %455  ;;  %v814_v16 = vrot.slane %v1755_v53, %v1567_v20  ;;  %v1243_v53 = vsel %vm1203_vm3, %v862_v59, %v1745_v43  ;;  %v870_v43 = vrot.slane %v1725_v23, %v1567_v20  ;;  %v878_v23 = vrot.slane %v1798_v36, %v1567_v20 }
 0x1ab   :  { %v1244_v8 = vsel %vm1205_vm4, %v866_v63, %v1243_v53  ;;  %v958_v4 = vrot.slane %v1818_v52, %v1567_v20  ;;  %v954_v59 = vrot.slane %v1782_v17, %v1567_v20  ;;  %v998_v56 = vrot.slane %v1821_v57, %v1567_v20 }
 0x1ac   :  { %v1233_v12 = vsel %vm1211_vm7, %v814_v16, %v1723_v5  ;;  %v1245_v1 = vsel %vm1207_vm5, %v870_v43, %v1244_v8  ;;  %v1010_v57 = vrot.slane %v1808_v48, %v1567_v20 }
 0x1ad   :  { %v1246_v42 = vsel %vm1209_vm6, %v874_v21, %v1245_v1 }
 0x1ae   :  { %v1825_v58 = vpop.xlane.xlu1 %447  ;;  %1335 = vxpose.xlu0.b32.cont [2/16] (narrow) %v1689_v45, 8  ;;  %v1828_v47 = vpop.xlane.xlu0 %477  ;;  %v882_v45 = vrot.slane %v1697_v55, %v1567_v20  ;;  %v894_v55 = vrot.slane %v1785_v22, %v1567_v20  ;;  %v1247_v38 = vsel %vm1211_vm7, %v878_v23, %v1246_v42  ;;  %v986_v23 = vrot.slane %v1800_v39, %v1567_v20 }
 0x1af   :  { %v982_v44 = vrot.slane %v1825_v58, %v1567_v20 }
 0x1b0   :  { %v1248_v7 = vsel %vm1199_vm1, %v886_v62, %v882_v45  ;;  %v1258_v62 = vsel %vm1205_vm4, %v930_v34, %v1257_v41  ;;  %v1263_v45 = vsel %vm1201_vm2, %v954_v59, %v1262_v46 }
 0x1b1   :  { %v1249_v22 = vsel %vm1201_vm2, %v890_v3, %v1248_v7  ;;  %v1264_v9 = vsel %vm1203_vm3, %v958_v4, %v1263_v45  ;;  %v1259_v3 = vsel %vm1207_vm5, %v934_v51, %v1258_v62 }
 0x1b2   :  { %v438_v2 = vpop.xlane.xlu1 %437  ;;  %1336 = vxpose.xlu0.b32.cont [3/16] (narrow) %v1226_v11, 8  ;;  %v1842_v6 = vpop.xlane.xlu0 %457  ;;  %v1250_v5 = vsel %vm1203_vm3, %v894_v55, %v1249_v22 }
 0x1b3   :  { %v1251_v29 = vsel %vm1205_vm4, %v898_v0, %v1250_v5  ;;  %v962_v16 = vrot.slane %v438_v2, %v1567_v20  ;;  %v938_v2 = vrot.slane %v1795_v32, %v1567_v20  ;;  %v970_v0 = vrot.slane %v1812_v50, %v1567_v20 }
 0x1b4   :  { %v1252_v54 = vsel %vm1207_vm5, %v902_v31, %v1251_v29  ;;  %v1269_v50 = vsel %vm1199_vm1, %v982_v44, %v978_v26  ;;  %v1002_v39 = vrot.slane %v1842_v6, %v1567_v20 }
 0x1b5   :  { %v1253_v52 = vsel %vm1209_vm6, %v906_v37, %v1252_v54  ;;  %v1265_v53 = vsel %vm1205_vm4, %v962_v16, %v1264_v9  ;;  %v1260_v55 = vsel %vm1209_vm6, %v938_v2, %v1259_v3  ;;  %v1270_v58 = vsel %vm1201_vm2, %v986_v23, %v1269_v50 }
 0x1b6   :  { %v428_v14 = vpop.xlane.xlu1 %427  ;;  %1337 = vxpose.xlu0.b32.cont [4/16] (narrow) %v1233_v12, 8  ;;  %v1863_v19 = vpop.xlane.xlu0 %481  ;;  %v1254_v17 = vsel %vm1211_vm7, %v910_v60, %v1253_v52  ;;  %v1266_v10 = vsel %vm1207_vm5, %v966_v33, %v1265_v53  ;;  %v1018_v60 = vrot.slane %v1816_v49, %v1567_v20 }
 0x1b7   :  { %v942_v61 = vrot.slane %v428_v14, %v1567_v20  ;;  %v1267_v14 = vsel %vm1209_vm6, %v970_v0, %v1266_v10 }
 0x1b9   :  { %v1261_v8 = vsel %vm1211_vm7, %v942_v61, %v1260_v55 }
 0x1ba   :  { %v452_v35 = vpop.xlane.xlu1 %451  ;;  %1338 = vxpose.xlu0.b32.cont [5/16] (narrow) %v1240_v27, 8  ;;  %v1888_v36 = vpop.xlane.xlu0 %471 }
 0x1bb   :  { %v990_v5 = vrot.slane %v452_v35, %v1567_v20  ;;  %v1030_v51 = vrot.slane %v1888_v36, %v1567_v20 }
 0x1bd   :  { %v1271_v29 = vsel %vm1203_vm3, %v990_v5, %v1270_v58 }
 0x1be   :  { %v464_v63 = vpop.xlane.xlu1 %463  ;;  %1339 = vxpose.xlu0.b32.cont [6/16] (narrow) %v1247_v38, 8  ;;  %v1908_v11 = vpop.xlane.xlu0 %493 }
 0x1bf   :  { %v1014_v13 = vrot.slane %v464_v63, %v1567_v20 }
 0x1c1   :  { %v1276_v46 = vsel %vm1199_vm1, %v1014_v13, %v1010_v57 }
 0x1c2   :  { %v454_v7 = vpop.xlane.xlu1 %453  ;;  %1340 = vxpose.xlu0.b32.cont [7/16] (narrow) %v1254_v17, 8  ;;  %v474_v24 = vpop.xlane.xlu0 %473  ;;  %v1277_v59 = vsel %vm1201_vm2, %v1018_v60, %v1276_v46 }
 0x1c3   :  { %v994_v27 = vrot.slane %v454_v7, %v1567_v20  ;;  %v1034_v52 = vrot.slane %v474_v24, %v1567_v20  ;;  %v1042_v7 = vrot.slane %v1828_v47, %v1567_v20  ;;  %v1050_v24 = vrot.slane %v1863_v19, %v1567_v20 }
 0x1c5   :  { %v1272_v25 = vsel %vm1205_vm4, %v994_v27, %v1271_v29 }
 0x1c6   :  { %v444_v12 = vpop.xlane.xlu1 %443  ;;  %1341 = vxpose.xlu0.b32.cont [8/16] (narrow) %v1261_v8, 8  ;;  %v1928_v32 = vpop.xlane.xlu0 %497  ;;  %v1273_v31 = vsel %vm1207_vm5, %v998_v56, %v1272_v25 }
 0x1c7   :  { %v974_v43 = vrot.slane %v444_v12, %v1567_v20  ;;  %v1274_v42 = vsel %vm1209_vm6, %v1002_v39, %v1273_v31  ;;  %v1082_v25 = vrot.slane %v1928_v32, %v1567_v20 }
 0x1c9   :  { %v1268_v15 = vsel %vm1211_vm7, %v974_v43, %v1267_v14 }
 0x1ca   :  { %v468_v21 = vpop.xlane.xlu1 %467  ;;  %1342 = vxpose.xlu0.b32.cont [9/16] (narrow) %v1268_v15, 8  ;;  %v488_v22 = vpop.xlane.xlu0 %487 }
 0x1cb   :  { %v1022_v6 = vrot.slane %v468_v21, %v1567_v20  ;;  %v1062_v47 = vrot.slane %v488_v22, %v1567_v20  ;;  %v1074_v22 = vrot.slane %v1908_v11, %v1567_v20 }
 0x1cd   :  { %v1278_v62 = vsel %vm1203_vm3, %v1022_v6, %v1277_v59 }
 0x1ce   :  { %v480_v1 = vpop.xlane.xlu1 %479  ;;  %v1942_v30 = vpop.xlane.xlu0 %509 }
 0x1cf   :  { %v1046_v3 = vrot.slane %v480_v1, %v1567_v20 }
 0x1d1   :  { %v1283_v36 = vsel %vm1199_vm1, %v1046_v3, %v1042_v7 }
 0x1d2   :  { %v470_v18 = vpop.xlane.xlu1 %469  ;;  %v490_v28 = vpop.xlane.xlu0 %489  ;;  %v1284_v0 = vsel %vm1201_vm2, %v1050_v24, %v1283_v36 }
 0x1d3   :  { %v1026_v4 = vrot.slane %v470_v18, %v1567_v20  ;;  %v1066_v21 = vrot.slane %v490_v28, %v1567_v20 }
 0x1d5   :  { %v1279_v16 = vsel %vm1205_vm4, %v1026_v4, %v1278_v62  ;;  %v1106_v4 = vrot.slane %v1942_v30, %v1567_v20 }
 0x1d6   :  { %v460_v34 = vpop.xlane.xlu1 %459  ;;  %v1952_v35 = vpop.xlane.xlu0 %513  ;;  %v1280_v45 = vsel %vm1207_vm5, %v1030_v51, %v1279_v16 }
 0x1d7   :  { %v1006_v40 = vrot.slane %v460_v34, %v1567_v20  ;;  %v1281_v17 = vsel %vm1209_vm6, %v1034_v52, %v1280_v45  ;;  %v1114_v16 = vrot.slane %v1952_v35, %v1567_v20 }
 0x1d9   :  { %v1275_v38 = vsel %vm1211_vm7, %v1006_v40, %v1274_v42 }
 0x1da   :  { %v484_v54 = vpop.xlane.xlu1 %483  ;;  %1343 = vxpose.xlu0.b32.cont [10/16] (narrow) %v1275_v38, 8  ;;  %v504_v41 = vpop.xlane.xlu0 %503 }
 0x1db   :  { %v1054_v33 = vrot.slane %v484_v54, %v1567_v20  ;;  %v1094_v11 = vrot.slane %v504_v41, %v1567_v20 }
 0x1dd   :  { %v1285_v12 = vsel %vm1203_vm3, %v1054_v33, %v1284_v0 }
 0x1de   :  { %v496_v37 = vpop.xlane.xlu1 %495  ;;  %v1968_v63 = vpop.xlane.xlu0 %525 }
 0x1df   :  { %v1078_v5 = vrot.slane %v496_v37, %v1567_v20 }
 0x1e1   :  { %v1290_v58 = vsel %vm1199_vm1, %v1078_v5, %v1074_v22 }
 0x1e2   :  { %v486_v48 = vpop.xlane.xlu1 %485  ;;  %v506_v61 = vpop.xlane.xlu0 %505  ;;  %v1291_v56 = vsel %vm1201_vm2, %v1082_v25, %v1290_v58 }
 0x1e3   :  { %v1058_v55 = vrot.slane %v486_v48, %v1567_v20  ;;  %v1098_v13 = vrot.slane %v506_v61, %v1567_v20  ;;  %v1138_v48 = vrot.slane %v1968_v63, %v1567_v20 }
 0x1e5   :  { %v1286_v43 = vsel %vm1205_vm4, %v1058_v55, %v1285_v12 }
 0x1e6   :  { %v476_v49 = vpop.xlane.xlu1 %475  ;;  %v530_v8 = vpop.xlane.xlu0 %529  ;;  %v1287_v15 = vsel %vm1207_vm5, %v1062_v47, %v1286_v43 }
 0x1e7   :  { %v1038_v9 = vrot.slane %v476_v49, %v1567_v20  ;;  %v1288_v50 = vsel %vm1209_vm6, %v1066_v21, %v1287_v15 }
 0x1e9   :  { %v1282_v2 = vsel %vm1211_vm7, %v1038_v9, %v1281_v17  ;;  %v1146_v9 = vrot.slane %v530_v8, %v1567_v20 }
 0x1ea   :  { %v500_v53 = vpop.xlane.xlu1 %499  ;;  %1344 = vxpose.xlu0.b32.cont [11/16] (narrow) %v1282_v2, 8  ;;  %v520_v44 = vpop.xlane.xlu0 %519 }
 0x1eb   :  { %v1086_v29 = vrot.slane %v500_v53, %v1567_v20  ;;  %v1126_v2 = vrot.slane %v520_v44, %v1567_v20 }
 0x1ed   :  { %v1292_v39 = vsel %vm1203_vm3, %v1086_v29, %v1291_v56 }
 0x1ee   :  { %v512_v10 = vpop.xlane.xlu1 %511  ;;  %v1995_v27 = vpop.xlane.xlu0 %541 }
 0x1ef   :  { %v1110_v46 = vrot.slane %v512_v10, %v1567_v20 }
 0x1f1   :  { %v1297_v59 = vsel %vm1199_vm1, %v1110_v46, %v1106_v4 }
 0x1f2   :  { %v502_v14 = vpop.xlane.xlu1 %501  ;;  %v522_v31 = vpop.xlane.xlu0 %521  ;;  %v1298_v52 = vsel %vm1201_vm2, %v1114_v16, %v1297_v59 }
 0x1f3   :  { %v1090_v18 = vrot.slane %v502_v14, %v1567_v20  ;;  %v1130_v55 = vrot.slane %v522_v31, %v1567_v20 }
 0x1f5   :  { %v1293_v34 = vsel %vm1205_vm4, %v1090_v18, %v1292_v39 }
 0x1f6   :  { %v492_v26 = vpop.xlane.xlu1 %491  ;;  %v1294_v42 = vsel %vm1207_vm5, %v1094_v11, %v1293_v34  ;;  %v546_v38 = vpop.xlane.xlu0 %545 }
 0x1f7   :  { %v1070_v19 = vrot.slane %v492_v26, %v1567_v20  ;;  %v1295_v57 = vsel %vm1209_vm6, %v1098_v13, %v1294_v42  ;;  %v1178_v22 = vrot.slane %v546_v38, %v1567_v20 }
 0x1f9   :  { %v1289_v23 = vsel %vm1211_vm7, %v1070_v19, %v1288_v50  ;;  %v1170_v19 = vrot.slane %v1995_v27, %v1567_v20 }
 0x1fa   :  { %v516_v1 = vpop.xlane.xlu1 %515  ;;  %1345 = vxpose.xlu0.b32.cont [12/16] (narrow) %v1289_v23, 8  ;;  %v536_v41 = vpop.xlane.xlu0 %535 }
 0x1fb   :  { %v1118_v62 = vrot.slane %v516_v1, %v1567_v20  ;;  %v1158_v36 = vrot.slane %v536_v41, %v1567_v20 }
 0x1fd   :  { %v1299_v61 = vsel %vm1203_vm3, %v1118_v62, %v1298_v52 }
 0x1fe   :  { %v528_v28 = vpop.xlane.xlu1 %527  ;;  %v538_v17 = vpop.xlane.xlu0 %537 }
 0x1ff   :  { %v1142_v37 = vrot.slane %v528_v28, %v1567_v20  ;;  %v1162_v12 = vrot.slane %v538_v17, %v1567_v20 }
 0x201   :  { %v1304_v30 = vsel %vm1199_vm1, %v1142_v37, %v1138_v48 }
 0x202   :  { %v518_v40 = vpop.xlane.xlu1 %517  ;;  %v1305_v63 = vsel %vm1201_vm2, %v1146_v9, %v1304_v30  ;;  %v540_v43 = vpop.xlane.xlu0 %539 }
 0x203   :  { %v1122_v51 = vrot.slane %v518_v40, %v1567_v20  ;;  %v1166_v21 = vrot.slane %v540_v43, %v1567_v20 }
 0x205   :  { %v1300_v3 = vsel %vm1205_vm4, %v1122_v51, %v1299_v61 }
 0x206   :  { %v508_v54 = vpop.xlane.xlu1 %507  ;;  %v1301_v24 = vsel %vm1207_vm5, %v1126_v2, %v1300_v3  ;;  %v554_v18 = vpop.xlane.xlu0 %553 }
 0x207   :  { %v1102_v32 = vrot.slane %v508_v54, %v1567_v20  ;;  %v1302_v14 = vsel %vm1209_vm6, %v1130_v55, %v1301_v24  ;;  %v1194_v39 = vrot.slane %v554_v18, %v1567_v20 }
 0x209   :  { %v1296_v6 = vsel %vm1211_vm7, %v1102_v32, %v1295_v57 }
 0x20a   :  { %v532_v60 = vpop.xlane.xlu1 %531  ;;  %1346 = vxpose.xlu0.b32.cont [13/16] (narrow) %v1296_v6, 8 }
 0x20b   :  { %v1150_v49 = vrot.slane %v532_v60, %v1567_v20 }
 0x20d   :  { %v1306_v7 = vsel %vm1203_vm3, %v1150_v49, %v1305_v63 }
 0x20e   :  { %v544_v45 = vpop.xlane.xlu1 %543 }
 0x20f   :  { %v1174_v26 = vrot.slane %v544_v45, %v1567_v20 }
 0x211   :  { %v1311_v23 = vsel %vm1199_vm1, %v1174_v26, %v1170_v19 }
 0x212   :  { %v534_v35 = vpop.xlane.xlu1 %533  ;;  %v1312_v29 = vsel %vm1201_vm2, %v1178_v22, %v1311_v23 }
 0x213   :  { %v1154_v53 = vrot.slane %v534_v35, %v1567_v20 }
 0x215   :  { %v1307_v33 = vsel %vm1205_vm4, %v1154_v53, %v1306_v7 }
 0x216   :  { %v524_v8 = vpop.xlane.xlu1 %523  ;;  %v1308_v0 = vsel %vm1207_vm5, %v1158_v36, %v1307_v33 }
 0x217   :  { %v1134_v10 = vrot.slane %v524_v8, %v1567_v20  ;;  %v1309_v15 = vsel %vm1209_vm6, %v1162_v12, %v1308_v0 }
 0x218   :  { %v1310_v50 = vsel %vm1211_vm7, %v1166_v21, %v1309_v15 }
 0x219   :  { %v1303_v47 = vsel %vm1211_vm7, %v1134_v10, %v1302_v14 }
 0x21a   :  { %v548_v44 = vpop.xlane.xlu1 %547  ;;  %1347 = vxpose.xlu0.b32.cont [14/16] (narrow) %v1303_v47, 8 }
 0x21b   :  { %v1182_v1 = vrot.slane %v548_v44, %v1567_v20 }
 0x21d   :  { %v1313_v28 = vsel %vm1203_vm3, %v1182_v1, %v1312_v29 }
 0x21e   :  { %v550_v5 = vpop.xlane.xlu1 %549  ;;  %1348 = vxpose.xlu0.b32.cont [15/16] (narrow) %v1310_v50, 8 }
 0x21f   :  { %v1186_v58 = vrot.slane %v550_v5, %v1567_v20 }
 0x221   :  { %v1314_v56 = vsel %vm1205_vm4, %v1186_v58, %v1313_v28 }
 0x222   :  { %v552_v25 = vpop.xlane.xlu1 %551 }
 0x223   :  { %v1190_v27 = vrot.slane %v552_v25, %v1567_v20 }
 0x225   :  { %v1315_v31 = vsel %vm1207_vm5, %v1190_v27, %v1314_v56 }
 0x226   :  { %v556_v34 = vpop.xlane.xlu1 %555  ;;  %v1316_v11 = vsel %vm1209_vm6, %v1194_v39, %v1315_v31 }
 0x227   :  { %v1198_v40 = vrot.slane %v556_v34, %v1567_v20 }
 0x229   :  { %v1317_v42 = vsel %vm1211_vm7, %v1198_v40, %v1316_v11 }
 0x22a   :  { %1349 = vxpose.xlu0.b32.end [16/16] (narrow) %v1317_v42, 8 }
 0x26a   :  { %v1350_v13 = vpop.trf.xlu0 }
 0x26b   :  { %1366 = vmax.xlane.f32.xlu1 %v1350_v13 }
 0x2f4   :  { %v1367_v38 = vpop.xlane.xlu1 %1366 }
 0x2f5   :  { %v1368_v54 = vsub.f32 %v1350_v13, %v1367_v38 }
 0x2f7   :  { %v1369_v32 = vmul.f32 1.442695, %v1368_v54 }
 0x2f9   :  { %1398 = vpow2.f32 %v1369_v32 }
 0x306   :  { %v1399_v57 = vpop.eup %1398 }
 0x307   :  { %1371 = vadd.xlane.f32.xlu1 %v1399_v57 }
 0x390   :  { %v1372_v46 = vpop.xlane.xlu1 %1371 }
 0x391   :  { %1400 = vrcp.f32 %v1372_v46 }
 0x39e   :  { %v1401_v6 = vpop.eup %1400 }
 0x39f   :  { %v1374_v60 = vmul.f32 %v1401_v6, %v1399_v57 }
 0x3a1   :  { %1375 = vst [vmem:[#allocation7] sm:$0xff] %v1374_v60 }
 0x3a2   :  { %1453 = shalt.err (!%p1450_p0)
}
 0x3a3   :  { %1385 = dma.vmem_to_hbm [thread:$0]  %s1383_s1, 128, %s2067_s2, [#allocation4]  }
 0x3a4   :  { %1466 = dma.done.wait [#allocation4], 128  }
 0x3a5   :  { %1467 = vsyncadd [#allocation4], 4294967168 }
 0x3a6   :  { %1389 = vsyncpa [#allocation3], 1 }
 0x3a7   :  { %1390 = vsyncpa [#allocation6], 1 }
 0x3a8   :  { %1391 = vsyncpa [#allocation4], 1 }

</bundles_post_ra>
